<compile_context>
chip_gen: v6e
topology: v6e:2x2x1
jax: 0.10.0
libtpu: 0.0.40
codegen_flags: <defaults>
</compile_context>

<pallas_src>
import functools

import jax
import jax.numpy as jnp
from jax.experimental import pallas as pl
from jax.experimental.pallas import tpu as pltpu


# ----------------------------- fused Pallas kernel -----------------------------

def _recon_kernel(x_ref, y_ref, o_ref, *, u, a):
    """x_ref, y_ref: (u*u*a*a, tH, W);  o_ref: (tH*u*a, W*u*a).

    out[h*f + p, w*f + q] = (x + y)[(r2*a + s2)*u*u + r1*u + s1, h, w]
    with p = r1*a + r2, q = s1*a + s2, f = u*a  (PS(u,'spa') then PS(a,'ang')).
    """
    f = u * a
    _, th, w = x_ref.shape
    z = x_ref[...] + y_ref[...]                       # (f*f, tH, W)

    rows = []
    for p in range(f):                                # output-row phase p = r1*a + r2
        r1, r2 = p // a, p % a
        planes = []
        for q in range(f):                            # output-col phase q = s1*a + s2
            s1, s2 = q // a, q % a
            c = (r2 * a + s2) * (u * u) + r1 * u + s1
            planes.append(z[c][None])                 # (1, tH, W)
        zq = jnp.concatenate(planes, axis=0)          # (f, tH, W)    order [q][h][w]
        zq = zq.reshape(f, th * w).T                  # (tH*W, f)     order [(h w)][q]
        rows.append(zq.reshape(th, w * f))            # (tH, W*f)     order [h][(w q)]
    s = jnp.concatenate(rows, axis=1)                 # (tH, f*W*f)   order [h][(p w q)]
    o_ref[...] = s.reshape(th * f, w * f).astype(o_ref.dtype)


# --------------------------------- tiling helpers -------------------------------

def _sublane_multiple(dtype):
    return {4: 8, 2: 16, 1: 32}.get(jnp.dtype(dtype).itemsize, 8)


def _pick_tile_rows(H, W, f, dtype, outer_grid):
    """Rows (of the pre-shuffle H axis) per block."""
    isz = jnp.dtype(dtype).itemsize
    sub = _sublane_multiple(dtype)
    # Cap per-operand block at ~4 MiB and the padded (tH*W, f) relayout temp at ~4 MiB.
    cap = min(max(1, (4 * 1024 * 1024) // (f * f * W * isz)),
              max(1, 8192 // max(W, 1)))
    cap = max(cap, sub)
    if H <= cap:
        th = H
        # v7x has 2 TensorCores: give the parallel grid >=2 balanced steps when the rest
        # of the grid is 1 and the block is big enough to amortize the ~0.35 us/step.
        if outer_grid == 1 and H >= 2 * sub and f * f * H * W * isz >= 2 * 1024 * 1024:
            half = ((H + 1) // 2 + sub - 1) // sub * sub
            th = min(H, half)
        return th
    # Prefer a divisor of H that is a multiple of the sublane tile (no ragged edge).
    d = (cap // sub) * sub
    while d >= sub:
        if H % d == 0:
            return d
        d -= sub
    return max(sub, (cap // sub) * sub)   # ragged last tile; Pallas masks OOB rows


def _vmem_limit_bytes(block_bytes, pad_bytes):
    try:
        phys = int(pltpu.get_tpu_info().vmem_capacity_bytes)
    except Exception:
        phys = 64 * 1024 * 1024                       # assume smallest (v7x per-TC)
    cap = min((phys * 3) // 4, 100 * 1024 * 1024)     # ~48 MiB on v7x, ~96 MiB v5e/v6e
    need = 12 * block_bytes + 2 * pad_bytes + 8 * 1024 * 1024
    floor = min(32 * 1024 * 1024, cap)
    return int(min(cap, max(need, floor)))


# ------------------------------- fused entry point ------------------------------

@functools.partial(jax.jit, static_argnums=(2, 3))
def _recon_block_fused(pic_in_1, pic_in_2, ang_res, upscale_factor):
    u, a = int(upscale_factor), int(ang_res)
    f = u * a
    assert pic_in_1.shape == pic_in_2.shape and pic_in_1.dtype == pic_in_2.dtype
    B, C, H, W = pic_in_1.shape
    assert C % (f * f) == 0, "channels must be divisible by (upscale_factor*ang_res)^2"
    C2 = C // (f * f)
    dtype = pic_in_1.dtype
    isz = jnp.dtype(dtype).itemsize

    th = _pick_tile_rows(H, W, f, dtype, B * C2)
    grid = (B, C2, pl.cdiv(H, th))

    block_bytes = f * f * th * W * isz                # per-operand block == output block
    pad_bytes = th * W * 128 * isz                    # padded (tH*W, f) relayout temp
    kernel = functools.partial(_recon_kernel, u=u, a=a)

    return pl.pallas_call(
        kernel,
        out_shape=jax.ShapeDtypeStruct((B, C2, H * f, W * f), dtype),
        grid=grid,
        in_specs=[
            pl.BlockSpec((None, f * f, th, W), lambda b, c, h: (b, c, h, 0)),
            pl.BlockSpec((None, f * f, th, W), lambda b, c, h: (b, c, h, 0)),
        ],
        out_specs=pl.BlockSpec((None, None, th * f, W * f), lambda b, c, h: (b, c, h, 0)),
        compiler_params=pltpu.CompilerParams(
            dimension_semantics=("parallel", "parallel", "parallel"),
            vmem_limit_bytes=_vmem_limit_bytes(block_bytes, pad_bytes),
        ),
    )(pic_in_1, pic_in_2)


# ------------------------------- robustness fallback -----------------------------

def _add_kernel(x_ref, y_ref, o_ref):
    o_ref[...] = x_ref[...] + y_ref[...]


@functools.partial(jax.jit, static_argnums=(2, 3))
def _recon_block_fallback(pic_in_1, pic_in_2, ang_res, upscale_factor):
    """Pallas add + one XLA reshape/transpose/reshape (PS(u) then PS(a))."""
    u, a = int(upscale_factor), int(ang_res)
    f = u * a
    B, C, H, W = pic_in_1.shape
    C2 = C // (f * f)
    buf = pl.pallas_call(
        _add_kernel,
        out_shape=jax.ShapeDtypeStruct(pic_in_1.shape, pic_in_1.dtype),
        grid=(B,),
        in_specs=[
            pl.BlockSpec((1, C, H, W), lambda b: (b, 0, 0, 0)),
            pl.BlockSpec((1, C, H, W), lambda b: (b, 0, 0, 0)),
        ],
        out_specs=pl.BlockSpec((1, C, H, W), lambda b: (b, 0, 0, 0)),
        compiler_params=pltpu.CompilerParams(dimension_semantics=("parallel",)),
    )(pic_in_1, pic_in_2)
    buf = buf.reshape(B, C2, a, a, u, u, H, W)          # b,c2,r2,s2,r1,s1,h,w
    buf = jnp.transpose(buf, (0, 1, 6, 4, 2, 7, 5, 3))  # b,c2,h,r1,r2,w,s1,s2
    return buf.reshape(B, C2, H * f, W * f)


def recon_block(pic_in_1, pic_in_2, ang_res, upscale_factor):
    try:
        return _recon_block_fused(pic_in_1, pic_in_2, ang_res, upscale_factor)
    except Exception:
        # Guard against Mosaic lowering differences across jax versions.
        return _recon_block_fallback(pic_in_1, pic_in_2, ang_res, upscale_factor)


# --------------------------------- pure-JAX reference ----------------------------

def _pixel_shuffle_ref(x, r):
    """torch.nn.PixelShuffle semantics, NCHW."""
    B, C, H, W = x.shape
    c_out = C // (r * r)
    x = x.reshape(B, c_out, r, r, H, W)
    x = jnp.transpose(x, (0, 1, 4, 2, 5, 3))
    return x.reshape(B, c_out, H * r, W * r)


def recon_block_ref(pic_in_1, pic_in_2, ang_res, upscale_factor):
    buf = pic_in_1 + pic_in_2
    buf = _pixel_shuffle_ref(buf, upscale_factor)   # 'spa'
    return _pixel_shuffle_ref(buf, ang_res)         # 'ang'


# --------------------------------------- demo ------------------------------------

if __name__ == "__main__":
    ang_res = 2
    upscale_factor = 2
    f = ang_res * upscale_factor                     # 4
    B, H, W = 2, 32, 32
    C = 2 * f * f                                    # 32 channels -> 2 output groups

    key = jax.random.PRNGKey(0)
    k1, k2 = jax.random.split(key)
    pic_in_1 = jax.random.normal(k1, (B, C, H, W), dtype=jnp.float32)
    pic_in_2 = jax.random.normal(k2, (B, C, H, W), dtype=jnp.float32)

    out = recon_block(pic_in_1, pic_in_2, ang_res, upscale_factor)
    out = jax.block_until_ready(out)

    expected_shape = (B, C // (f * f), H * f, W * f)
    assert out.shape == expected_shape, (out.shape, expected_shape)

    ref = recon_block_ref(pic_in_1, pic_in_2, ang_res, upscale_factor)
    assert jnp.allclose(out, ref, atol=1e-6, rtol=1e-6)

    print("KERNEL_OK")
</pallas_src>

<mosaic_0001>
module attributes {stable_mosaic.version = 11 : i64} {
  func.func @_recon_kernel(%arg0: i32, %arg1: i32, %arg2: i32, %arg3: memref<1x16x32x32xf32, #tpu.memory_space<vmem>>, %arg4: memref<1x16x32x32xf32, #tpu.memory_space<vmem>>, %arg5: memref<1x1x128x128xf32, #tpu.memory_space<vmem>>) attributes {dimension_semantics = [#tpu.dimension_semantics<parallel>, #tpu.dimension_semantics<parallel>, #tpu.dimension_semantics<parallel>], iteration_bounds = array<i64: 2, 2, 1>, scalar_prefetch = 0 : i64, scratch_operands = 0 : i64, tpu.core_type = #tpu.core_type<tc>, window_params = [{transform_indices = @transform_0, window_bounds = array<i64: 1, 16, 32, 32>}, {transform_indices = @transform_1, window_bounds = array<i64: 1, 16, 32, 32>}, {transform_indices = @transform_2, window_bounds = array<i64: 1, 1, 128, 128>}]} {
    %c0 = arith.constant 0 : index
    %c0_0 = arith.constant 0 : index
    %c0_1 = arith.constant 0 : index
    %c0_2 = arith.constant 0 : index
    %0 = vector.load %arg3[%c0, %c0_0, %c0_1, %c0_2] : memref<1x16x32x32xf32, #tpu.memory_space<vmem>>, vector<1x16x32x32xf32>
    %1 = vector.shape_cast %0 : vector<1x16x32x32xf32> to vector<16x32x32xf32>
    %c0_3 = arith.constant 0 : index
    %c0_4 = arith.constant 0 : index
    %c0_5 = arith.constant 0 : index
    %c0_6 = arith.constant 0 : index
    %2 = vector.load %arg4[%c0_3, %c0_4, %c0_5, %c0_6] : memref<1x16x32x32xf32, #tpu.memory_space<vmem>>, vector<1x16x32x32xf32>
    %3 = vector.shape_cast %2 : vector<1x16x32x32xf32> to vector<16x32x32xf32>
    %4 = arith.addf %1, %3 : vector<16x32x32xf32>
    %5 = vector.extract_strided_slice %4 {offsets = [0, 0, 0], sizes = [1, 32, 32], strides = [1, 1, 1]} : vector<16x32x32xf32> to vector<1x32x32xf32>
    %6 = vector.shape_cast %5 : vector<1x32x32xf32> to vector<32x32xf32>
    %7 = vector.shape_cast %6 : vector<32x32xf32> to vector<1x32x32xf32>
    %8 = vector.extract_strided_slice %4 {offsets = [4, 0, 0], sizes = [1, 32, 32], strides = [1, 1, 1]} : vector<16x32x32xf32> to vector<1x32x32xf32>
    %9 = vector.shape_cast %8 : vector<1x32x32xf32> to vector<32x32xf32>
    %10 = vector.shape_cast %9 : vector<32x32xf32> to vector<1x32x32xf32>
    %11 = vector.extract_strided_slice %4 {offsets = [1, 0, 0], sizes = [1, 32, 32], strides = [1, 1, 1]} : vector<16x32x32xf32> to vector<1x32x32xf32>
    %12 = vector.shape_cast %11 : vector<1x32x32xf32> to vector<32x32xf32>
    %13 = vector.shape_cast %12 : vector<32x32xf32> to vector<1x32x32xf32>
    %14 = vector.extract_strided_slice %4 {offsets = [5, 0, 0], sizes = [1, 32, 32], strides = [1, 1, 1]} : vector<16x32x32xf32> to vector<1x32x32xf32>
    %15 = vector.shape_cast %14 : vector<1x32x32xf32> to vector<32x32xf32>
    %16 = vector.shape_cast %15 : vector<32x32xf32> to vector<1x32x32xf32>
    %17 = tpu.concatenate %7, %10, %13, %16 in 0 : vector<1x32x32xf32>, vector<1x32x32xf32>, vector<1x32x32xf32>, vector<1x32x32xf32> -> vector<4x32x32xf32>
    %18 = vector.shape_cast %17 : vector<4x32x32xf32> to vector<4x1024xf32>
    %19 = tpu.transpose %18, [1, 0] : vector<4x1024xf32> -> vector<1024x4xf32>
    %20 = vector.shape_cast %19 : vector<1024x4xf32> to vector<32x128xf32>
    %21 = vector.extract_strided_slice %4 {offsets = [8, 0, 0], sizes = [1, 32, 32], strides = [1, 1, 1]} : vector<16x32x32xf32> to vector<1x32x32xf32>
    %22 = vector.shape_cast %21 : vector<1x32x32xf32> to vector<32x32xf32>
    %23 = vector.shape_cast %22 : vector<32x32xf32> to vector<1x32x32xf32>
    %24 = vector.extract_strided_slice %4 {offsets = [12, 0, 0], sizes = [1, 32, 32], strides = [1, 1, 1]} : vector<16x32x32xf32> to vector<1x32x32xf32>
    %25 = vector.shape_cast %24 : vector<1x32x32xf32> to vector<32x32xf32>
    %26 = vector.shape_cast %25 : vector<32x32xf32> to vector<1x32x32xf32>
    %27 = vector.extract_strided_slice %4 {offsets = [9, 0, 0], sizes = [1, 32, 32], strides = [1, 1, 1]} : vector<16x32x32xf32> to vector<1x32x32xf32>
    %28 = vector.shape_cast %27 : vector<1x32x32xf32> to vector<32x32xf32>
    %29 = vector.shape_cast %28 : vector<32x32xf32> to vector<1x32x32xf32>
    %30 = vector.extract_strided_slice %4 {offsets = [13, 0, 0], sizes = [1, 32, 32], strides = [1, 1, 1]} : vector<16x32x32xf32> to vector<1x32x32xf32>
    %31 = vector.shape_cast %30 : vector<1x32x32xf32> to vector<32x32xf32>
    %32 = vector.shape_cast %31 : vector<32x32xf32> to vector<1x32x32xf32>
    %33 = tpu.concatenate %23, %26, %29, %32 in 0 : vector<1x32x32xf32>, vector<1x32x32xf32>, vector<1x32x32xf32>, vector<1x32x32xf32> -> vector<4x32x32xf32>
    %34 = vector.shape_cast %33 : vector<4x32x32xf32> to vector<4x1024xf32>
    %35 = tpu.transpose %34, [1, 0] : vector<4x1024xf32> -> vector<1024x4xf32>
    %36 = vector.shape_cast %35 : vector<1024x4xf32> to vector<32x128xf32>
    %37 = vector.extract_strided_slice %4 {offsets = [2, 0, 0], sizes = [1, 32, 32], strides = [1, 1, 1]} : vector<16x32x32xf32> to vector<1x32x32xf32>
    %38 = vector.shape_cast %37 : vector<1x32x32xf32> to vector<32x32xf32>
    %39 = vector.shape_cast %38 : vector<32x32xf32> to vector<1x32x32xf32>
    %40 = vector.extract_strided_slice %4 {offsets = [6, 0, 0], sizes = [1, 32, 32], strides = [1, 1, 1]} : vector<16x32x32xf32> to vector<1x32x32xf32>
    %41 = vector.shape_cast %40 : vector<1x32x32xf32> to vector<32x32xf32>
    %42 = vector.shape_cast %41 : vector<32x32xf32> to vector<1x32x32xf32>
    %43 = vector.extract_strided_slice %4 {offsets = [3, 0, 0], sizes = [1, 32, 32], strides = [1, 1, 1]} : vector<16x32x32xf32> to vector<1x32x32xf32>
    %44 = vector.shape_cast %43 : vector<1x32x32xf32> to vector<32x32xf32>
    %45 = vector.shape_cast %44 : vector<32x32xf32> to vector<1x32x32xf32>
    %46 = vector.extract_strided_slice %4 {offsets = [7, 0, 0], sizes = [1, 32, 32], strides = [1, 1, 1]} : vector<16x32x32xf32> to vector<1x32x32xf32>
    %47 = vector.shape_cast %46 : vector<1x32x32xf32> to vector<32x32xf32>
    %48 = vector.shape_cast %47 : vector<32x32xf32> to vector<1x32x32xf32>
    %49 = tpu.concatenate %39, %42, %45, %48 in 0 : vector<1x32x32xf32>, vector<1x32x32xf32>, vector<1x32x32xf32>, vector<1x32x32xf32> -> vector<4x32x32xf32>
    %50 = vector.shape_cast %49 : vector<4x32x32xf32> to vector<4x1024xf32>
    %51 = tpu.transpose %50, [1, 0] : vector<4x1024xf32> -> vector<1024x4xf32>
    %52 = vector.shape_cast %51 : vector<1024x4xf32> to vector<32x128xf32>
    %53 = vector.extract_strided_slice %4 {offsets = [10, 0, 0], sizes = [1, 32, 32], strides = [1, 1, 1]} : vector<16x32x32xf32> to vector<1x32x32xf32>
    %54 = vector.shape_cast %53 : vector<1x32x32xf32> to vector<32x32xf32>
    %55 = vector.shape_cast %54 : vector<32x32xf32> to vector<1x32x32xf32>
    %56 = vector.extract_strided_slice %4 {offsets = [14, 0, 0], sizes = [1, 32, 32], strides = [1, 1, 1]} : vector<16x32x32xf32> to vector<1x32x32xf32>
    %57 = vector.shape_cast %56 : vector<1x32x32xf32> to vector<32x32xf32>
    %58 = vector.shape_cast %57 : vector<32x32xf32> to vector<1x32x32xf32>
    %59 = vector.extract_strided_slice %4 {offsets = [11, 0, 0], sizes = [1, 32, 32], strides = [1, 1, 1]} : vector<16x32x32xf32> to vector<1x32x32xf32>
    %60 = vector.shape_cast %59 : vector<1x32x32xf32> to vector<32x32xf32>
    %61 = vector.shape_cast %60 : vector<32x32xf32> to vector<1x32x32xf32>
    %62 = vector.extract_strided_slice %4 {offsets = [15, 0, 0], sizes = [1, 32, 32], strides = [1, 1, 1]} : vector<16x32x32xf32> to vector<1x32x32xf32>
    %63 = vector.shape_cast %62 : vector<1x32x32xf32> to vector<32x32xf32>
    %64 = vector.shape_cast %63 : vector<32x32xf32> to vector<1x32x32xf32>
    %65 = tpu.concatenate %55, %58, %61, %64 in 0 : vector<1x32x32xf32>, vector<1x32x32xf32>, vector<1x32x32xf32>, vector<1x32x32xf32> -> vector<4x32x32xf32>
    %66 = vector.shape_cast %65 : vector<4x32x32xf32> to vector<4x1024xf32>
    %67 = tpu.transpose %66, [1, 0] : vector<4x1024xf32> -> vector<1024x4xf32>
    %68 = vector.shape_cast %67 : vector<1024x4xf32> to vector<32x128xf32>
    %69 = tpu.concatenate %20, %36, %52, %68 in 1 : vector<32x128xf32>, vector<32x128xf32>, vector<32x128xf32>, vector<32x128xf32> -> vector<32x512xf32>
    %70 = vector.shape_cast %69 : vector<32x512xf32> to vector<128x128xf32>
    %c0_7 = arith.constant 0 : index
    %c0_8 = arith.constant 0 : index
    %c0_9 = arith.constant 0 : index
    %c0_10 = arith.constant 0 : index
    %71 = vector.load %arg5[%c0_7, %c0_8, %c0_9, %c0_10] : memref<1x1x128x128xf32, #tpu.memory_space<vmem>>, vector<1x1x128x128xf32>
    %72 = vector.shape_cast %71 : vector<1x1x128x128xf32> to vector<128x128xf32>
    %73 = vector.shape_cast %70 : vector<128x128xf32> to vector<1x1x128x128xf32>
    tpu.vector_store %arg5[%c0_7, %c0_8, %c0_9, %c0_10], %73 {strides = array<i32>} : memref<1x1x128x128xf32, #tpu.memory_space<vmem>>, vector<1x1x128x128xf32>,
    return
  }
  func.func @transform_0(%arg0: i32, %arg1: i32, %arg2: i32) -> (i32, i32, i32, i32) {
    %c0_i32 = arith.constant 0 : i32
    %c0_i32_0 = arith.constant 0 : i32
    return %arg0, %arg1, %arg2, %c0_i32 : i32, i32, i32, i32
  }
  func.func @transform_1(%arg0: i32, %arg1: i32, %arg2: i32) -> (i32, i32, i32, i32) {
    %c0_i32 = arith.constant 0 : i32
    %c0_i32_0 = arith.constant 0 : i32
    return %arg0, %arg1, %arg2, %c0_i32 : i32, i32, i32, i32
  }
  func.func @transform_2(%arg0: i32, %arg1: i32, %arg2: i32) -> (i32, i32, i32, i32) {
    %c0_i32 = arith.constant 0 : i32
    %c0_i32_0 = arith.constant 0 : i32
    return %arg0, %arg1, %arg2, %c0_i32 : i32, i32, i32, i32
  }
}

module attributes {stable_mosaic.version = 11 : i64} {
  func.func @_add_kernel(%arg0: i32, %arg1: memref<1x32x32x32xf32, #tpu.memory_space<vmem>>, %arg2: memref<1x32x32x32xf32, #tpu.memory_space<vmem>>, %arg3: memref<1x32x32x32xf32, #tpu.memory_space<vmem>>) attributes {dimension_semantics = [#tpu.dimension_semantics<parallel>], iteration_bounds = array<i64: 2>, scalar_prefetch = 0 : i64, scratch_operands = 0 : i64, tpu.core_type = #tpu.core_type<tc>, window_params = [{transform_indices = @transform_0, window_bounds = array<i64: 1, 32, 32, 32>}, {transform_indices = @transform_1, window_bounds = array<i64: 1, 32, 32, 32>}, {transform_indices = @transform_2, window_bounds = array<i64: 1, 32, 32, 32>}]} {
    %c0 = arith.constant 0 : index
    %c0_0 = arith.constant 0 : index
    %c0_1 = arith.constant 0 : index
    %c0_2 = arith.constant 0 : index
    %0 = vector.load %arg1[%c0, %c0_0, %c0_1, %c0_2] : memref<1x32x32x32xf32, #tpu.memory_space<vmem>>, vector<1x32x32x32xf32>
    %c0_3 = arith.constant 0 : index
    %c0_4 = arith.constant 0 : index
    %c0_5 = arith.constant 0 : index
    %c0_6 = arith.constant 0 : index
    %1 = vector.load %arg2[%c0_3, %c0_4, %c0_5, %c0_6] : memref<1x32x32x32xf32, #tpu.memory_space<vmem>>, vector<1x32x32x32xf32>
    %2 = arith.addf %0, %1 : vector<1x32x32x32xf32>
    %c0_7 = arith.constant 0 : index
    %c0_8 = arith.constant 0 : index
    %c0_9 = arith.constant 0 : index
    %c0_10 = arith.constant 0 : index
    %3 = vector.load %arg3[%c0_7, %c0_8, %c0_9, %c0_10] : memref<1x32x32x32xf32, #tpu.memory_space<vmem>>, vector<1x32x32x32xf32>
    tpu.vector_store %arg3[%c0_7, %c0_8, %c0_9, %c0_10], %2 {strides = array<i32>} : memref<1x32x32x32xf32, #tpu.memory_space<vmem>>, vector<1x32x32x32xf32>,
    return
  }
  func.func @transform_0(%arg0: i32) -> (i32, i32, i32, i32) {
    %c0_i32 = arith.constant 0 : i32
    %c0_i32_0 = arith.constant 0 : i32
    %c0_i32_1 = arith.constant 0 : i32
    %c0_i32_2 = arith.constant 0 : i32
    return %arg0, %c0_i32, %c0_i32_0, %c0_i32_1 : i32, i32, i32, i32
  }
  func.func @transform_1(%arg0: i32) -> (i32, i32, i32, i32) {
    %c0_i32 = arith.constant 0 : i32
    %c0_i32_0 = arith.constant 0 : i32
    %c0_i32_1 = arith.constant 0 : i32
    %c0_i32_2 = arith.constant 0 : i32
    return %arg0, %c0_i32, %c0_i32_0, %c0_i32_1 : i32, i32, i32, i32
  }
  func.func @transform_2(%arg0: i32) -> (i32, i32, i32, i32) {
    %c0_i32 = arith.constant 0 : i32
    %c0_i32_0 = arith.constant 0 : i32
    %c0_i32_1 = arith.constant 0 : i32
    %c0_i32_2 = arith.constant 0 : i32
    return %arg0, %c0_i32, %c0_i32_0, %c0_i32_1 : i32, i32, i32, i32
  }
}

</mosaic_0001>

<bundles_post_ra>
// kernel: _recon_block_fallback.1
= control target key start
LH: loop header
LB: loop body
LE: loop exit
PB: predicated region body
PF: predicated region fallthrough
CT: control target
= control target key end

     0   :  { %7 = vsyncpa [#allocation3], 0  ;;  %s1669_s0 = inlined_call_operand.hbm [shape: f32[2,32,32,32], index: 0, kind: input, shape index: {}]   ;;  %s1670_s1 = inlined_call_operand.hbm [shape: f32[2,32,32,32], index: 1, kind: input, shape index: {}]   ;;  %s1671_s2 = inlined_call_operand.vmem [shape: f32[2,32,32,32], index: 2, kind: output, shape index: {}]  }
   0x1   :  { %9 = vsyncpa [#allocation3 + $0x1], 0 }
   0x2   :  { %10 = vsyncpa [#allocation5], 0 }
   0x3   :  { %12 = vsyncpa [#allocation5 + $0x1], 0  ;;  %s987_s9 = smov 0   ;;  %s989_s10 = smov 0  }
   0x4   :  { %s991_s11 = smov 0   ;;  %s993_s12 = smov 0  }
   0x5 LB: > { %s1006_s13 = sadd.s32 4294967295, %s966_s12   ;;  %s1009_s14 = sadd.s32 1, %s966_s12   ;;  %s966_s12 = sphi %s993_s12, %s1681_s12   ;;  %s962_s11 = sphi %s991_s11, %s1680_s11   ;;  %s958_s10 = sphi %s989_s10, %s1679_s10   ;;  %s954_s9 = sphi %s987_s9, %s1678_s9  }
   0x6   : > { %s22_s15 = ssub.s32 %s966_s12, %s1009_s14  ;;  %s25_s16 = sadd.s32 1, %s962_s11 }
   0x7   : > { %p23_p0 = scmp.eq.s32.totalorder %s22_s15, 0  ;;  %p32_p1 = scmp.ne.s32.totalorder %s962_s11, %s958_s10 }
   0x8   : > { %p33_p2 = scmp.eq.s32.totalorder %s966_s12, 0  ;;  %p38_p3 = scmp.ne.s32.totalorder %s958_s10, %s954_s9 }
   0x9   : > { %s1019_s17 = scalar_select %p23_p0, %s962_s11, %s25_s16  }
   0xa   : > { %p34_p4 = por %p33_p2, %p32_p1  ;;  %p39_p5 = scmp.eq.s32.totalorder %s1006_s13, 0 }
   0xb   : > { %p837_p6 = scmp.lt.s32.totalorder %s966_s12, 2  ;;  %s1028_s19 = sand.u32 1, %s962_s11  }
   0xc   : > { %p1023_p7 = por %p39_p5, %p38_p3  ;;  %s810_s20 = sshll.u32 %s1028_s19, 10 }
   0xd   : > { %s823_s21 = sshll.u32 %s966_s12, 14  ;;  %s118_s25 = scalar_lea.vmem [#allocation2], %s810_s20 }
   0xe   : > { %s1673_s18 = scalar_select %p1023_p7, 1, 0 }
   0xf   : > { %s1037_s24 = scalar_lea.hbm %s1669_s0, %s823_s21  ;;  %s125_s26 = sshll.u32 %s118_s25, 4  ;;  %s1041_s26 = int_to_ptr.vmem [resolvable:$true] %s125_s26 }
  0x10   : > { %p1043_p8 = pnand %p837_p6, %p34_p4  ;;  %s115_s28 = scalar_lea.sflag [#allocation3], %s1028_s19 }
  0x11   : > { %s872_s29 = scalar_lea.hbm %s1037_s24, 16384  ;;  %s877_s4 = scalar_lea.hbm %s1669_s0, 32768 }
  0x12   : > { %p873_p10 = scmp.ne.s32.totalorder %s1037_s24, %s872_s29  ;;  %p874_p11 = pneg %p1043_p8 }
  0x13   : > { %p878_p0 = scmp.lt.s32.totalorder %s1037_s24, %s1669_s0  ;;  %p879_p1 = scmp.lt.s32.totalorder %s877_s4, %s872_s29 }
  0x14   : > { %p875_p12 = pnand %p874_p11, %p873_p10 }
  0x15   : > { %p880_p2 = por %p879_p1, %p878_p0 }
  0x16   : > { %p876_p13 = pneg %p875_p12 }
  0x18   : > { %p881_p3 = pnand %p880_p2, %p876_p13 }
  0x1a   : > { %884 = shalt.err (!%p881_p3)
}
  0x1b   : > { %s885_s7 = scalar_lea.vmem %s1041_s26, 16384  ;;  %s968_s8 = smov [#allocation2]  }
  0x1c   : > { %p886_p4 = scmp.ne.s32.totalorder %s1041_s26, %s885_s7  ;;  %s890_s9 = sshll.u32 %s968_s8, 4  ;;  %s891_s9 = int_to_ptr.vmem [resolvable:$false] %s890_s9 }
  0x1d   : > { %s892_s15 = scalar_lea.vmem %s891_s9, 32768  ;;  %p893_p10 = scmp.lt.s32.totalorder %s1041_s26, %s891_s9 }
  0x1e   : > { %p888_p5 = pnand %p886_p4, %p874_p11  ;;  %p894_p12 = scmp.lt.s32.totalorder %s892_s15, %s885_s7 }
  0x20   : > { %p889_p6 = pneg %p888_p5  ;;  %p895_p9 = por %p894_p12, %p893_p10 }
  0x22   : > { %p896_p0 = pnand %p895_p9, %p889_p6 }
  0x24   : > { %899 = shalt.err (!%p896_p0)
}
  0x25   : > { %s969_s16 = smov 128   ;;  %s970_s22 = smov 8  }
  0x26   : > { %833 = dma.hbm_to_vmem [thread:$0]  (!%p1043_p8), %s1037_s24, 16384, %s1041_s26, %s115_s28, %s969_s16, %s969_s16, %s970_s22  }
  0x27   : > { %p154_p9 = scmp.lt.s32.totalorder %s966_s12, 3  ;;  %s1084_s29 = scalar_lea.hbm %s1670_s1, %s823_s21 }
  0x28   : > { %p1675_p13 = scmp.ge.s32.totalorder %s966_s12, 1  ;;  %s139_s3 = scalar_lea.vmem [#allocation4], %s810_s20 }
  0x29   : > { %s146_s4 = sshll.u32 %s139_s3, 4  ;;  %s136_s24 = scalar_lea.sflag [#allocation5], %s1028_s19  ;;  %s1094_s4 = int_to_ptr.vmem [resolvable:$true] %s146_s4 }
  0x2a   : > { %p1088_p1 = pnand %p1675_p13, %p154_p9  ;;  %s900_s26 = scalar_lea.hbm %s1084_s29, 16384 }
  0x2b   : > { %p901_p2 = scmp.ne.s32.totalorder %s1084_s29, %s900_s26  ;;  %s905_s28 = scalar_lea.hbm %s1670_s1, 32768 }
  0x2c   : > { %p906_p5 = scmp.lt.s32.totalorder %s1084_s29, %s1670_s1  ;;  %p907_p6 = scmp.lt.s32.totalorder %s905_s28, %s900_s26 }
  0x2d   : > { %p903_p3 = pnand %p901_p2, %p874_p11 }
  0x2e   : > { %p908_p10 = por %p907_p6, %p906_p5 }
  0x2f   : > { %p904_p4 = pneg %p903_p3 }
  0x31   : > { %p909_p12 = pnand %p908_p10, %p904_p4 }
  0x33   : > { %912 = shalt.err (!%p909_p12)
}
  0x34   : > { %s913_s19 = scalar_lea.vmem %s1094_s4, 16384  ;;  %s971_s20 = smov [#allocation4]  }
  0x35   : > { %p914_p0 = scmp.ne.s32.totalorder %s1094_s4, %s913_s19  ;;  %s918_s7 = sshll.u32 %s971_s20, 4  ;;  %s919_s7 = int_to_ptr.vmem [resolvable:$false] %s918_s7 }
  0x36   : > { %s920_s8 = scalar_lea.vmem %s919_s7, 32768  ;;  %p921_p2 = scmp.lt.s32.totalorder %s1094_s4, %s919_s7 }
  0x37   : > { %p916_p9 = pnand %p914_p0, %p874_p11  ;;  %p922_p3 = scmp.lt.s32.totalorder %s920_s8, %s913_s19 }
  0x39   : > { %p917_p13 = pneg %p916_p9  ;;  %p923_p7 = por %p922_p3, %p921_p2 }
  0x3b   : > { %p924_p5 = pnand %p923_p7, %p917_p13 }
  0x3d   : > { %927 = shalt.err (!%p924_p5)
}
  0x3e   : > { %836 = dma.hbm_to_vmem [thread:$0]  (!%p1043_p8), %s1084_s29, 16384, %s1094_s4, %s136_s24, %s969_s16, %s969_s16, %s970_s22  }
  0x3f   : > { %158 = sbr.rel (%p1088_p1) target bundleno = 175 (0xaf), region = 28  ;;  %s160_s9 = sand.u32 (!%p1088_p1), 1, %s958_s10  }
  0x40   : > { %s817_s15 = sshll.u32 (!%p1088_p1), %s160_s9, 10  ;;  %s161_s23 = scalar_lea.sflag (!%p1088_p1), [#allocation3], %s160_s9 }
  0x41   : > { %s1125_s25 = scalar_lea.vmem (!%p1088_p1), [#allocation2], %s817_s15  ;;  %p1677_p7 = scmp.ne.s32.totalorder (!%p1088_p1), %s1673_s18, 0 }
  0x44   : > { %945 = dma.done.wait (%p1677_p7), %s161_s23, 16384  }
  0x45   : > { %947 = vsyncadd (%p1677_p7), %s161_s23, 4294950912  ;;  %s170_s27 = scalar_lea.sflag [#allocation5], %s160_s9  ;;  %s1131_s3 = scalar_lea.vmem [#allocation4], %s817_s15 }
  0x46   : > { %949 = dma.done.wait (%p1677_p7), %s170_s27, 16384  }
  0x47   : > { %951 = vsyncadd (%p1677_p7), %s170_s27, 4294950912  ;;  %p199_p8 = scmp.lt.s32.totalorder %s1006_s13, 1  ;;  %v204_v0 = vld [vmem:[%s1125_s25] sm:$0xff]  ;;  %vm588_vm0 = vcmask 261120   ;;  %v205_v2 = vld [vmem:[%s1125_s25 + $0x8] sm:$0xff] }
  0x48   : > { %v332_v1 = vld [vmem:[%s1131_s3] sm:$0xff]  ;;  %v333_v4 = vld [vmem:[%s1131_s3 + $0x8] sm:$0xff]  ;;  %v206_v5 = vld [vmem:[%s1125_s25 + $0x10] sm:$0xff] }
  0x49   : > { %s1683_s13 = smov (!%p199_p8, %s1006_s13), 1  ;;  %v460_v3 = vadd.f32 %v332_v1, %v204_v0  ;;  %v334_v6 = vld [vmem:[%s1131_s3 + $0x10] sm:$0xff]  ;;  %v461_v7 = vadd.f32 %v333_v4, %v205_v2  ;;  %v207_v9 = vld [vmem:[%s1125_s25 + $0x18] sm:$0xff]  ;;  %v208_v11 = vld [vmem:[%s1125_s25 + $0x20] sm:$0xff] }
  0x4a   : > { %s825_s16 = sshll.u32 %s1683_s13, 10  ;;  %v462_v8 = vadd.f32 %v334_v6, %v206_v5  ;;  %v335_v10 = vld [vmem:[%s1131_s3 + $0x18] sm:$0xff]  ;;  %v336_v13 = vld [vmem:[%s1131_s3 + $0x20] sm:$0xff]  ;;  %v209_v14 = vld [vmem:[%s1125_s25 + $0x28] sm:$0xff] }
  0x4b   : > { %s1142_s30 = scalar_lea.vmem %s1671_s2, %s825_s16  ;;  %v463_v12 = vadd.f32 %v335_v10, %v207_v9  ;;  %v337_v15 = vld [vmem:[%s1131_s3 + $0x28] sm:$0xff]  ;;  %v464_v16 = vadd.f32 %v336_v13, %v208_v11  ;;  %v210_v18 = vld [vmem:[%s1125_s25 + $0x30] sm:$0xff]  ;;  %v211_v20 = vld [vmem:[%s1125_s25 + $0x38] sm:$0xff] }
  0x4c   : > { %589 = vst.msk [vmem:[%s1142_s30] sm:$0xff] %vm588_vm0, %v460_v3  ;;  %590 = vst.msk [vmem:[%s1142_s30 + $0x8] sm:$0xff] %vm588_vm0, %v461_v7  ;;  %v465_v17 = vadd.f32 %v337_v15, %v209_v14  ;;  %v338_v19 = vld [vmem:[%s1131_s3 + $0x30] sm:$0xff]  ;;  %v339_v22 = vld [vmem:[%s1131_s3 + $0x38] sm:$0xff] }
  0x4d   : > { %591 = vst.msk [vmem:[%s1142_s30 + $0x10] sm:$0xff] %vm588_vm0, %v462_v8  ;;  %592 = vst.msk [vmem:[%s1142_s30 + $0x18] sm:$0xff] %vm588_vm0, %v463_v12  ;;  %v466_v21 = vadd.f32 %v338_v19, %v210_v18  ;;  %v212_v23 = vld [vmem:[%s1125_s25 + $0x40] sm:$0xff]  ;;  %v467_v25 = vadd.f32 %v339_v22, %v211_v20  ;;  %v213_v27 = vld [vmem:[%s1125_s25 + $0x48] sm:$0xff] }
  0x4e   : > { %v340_v24 = vld [vmem:[%s1131_s3 + $0x40] sm:$0xff]  ;;  %593 = vst.msk [vmem:[%s1142_s30 + $0x20] sm:$0xff] %vm588_vm0, %v464_v16  ;;  %594 = vst.msk [vmem:[%s1142_s30 + $0x28] sm:$0xff] %vm588_vm0, %v465_v17  ;;  %v341_v28 = vld [vmem:[%s1131_s3 + $0x48] sm:$0xff] }
  0x4f   : > { %v468_v26 = vadd.f32 %v340_v24, %v212_v23  ;;  %v214_v29 = vld [vmem:[%s1125_s25 + $0x50] sm:$0xff]  ;;  %595 = vst.msk [vmem:[%s1142_s30 + $0x30] sm:$0xff] %vm588_vm0, %v466_v21  ;;  %v469_v30 = vadd.f32 %v341_v28, %v213_v27  ;;  %v215_v32 = vld [vmem:[%s1125_s25 + $0x58] sm:$0xff]  ;;  %596 = vst.msk [vmem:[%s1142_s30 + $0x38] sm:$0xff] %vm588_vm0, %v467_v25 }
  0x50   : > { %v342_v31 = vld [vmem:[%s1131_s3 + $0x50] sm:$0xff]  ;;  %v343_v33 = vld [vmem:[%s1131_s3 + $0x58] sm:$0xff]  ;;  %v216_v36 = vld [vmem:[%s1125_s25 + $0x60] sm:$0xff] }
  0x51   : > { %597 = vst.msk [vmem:[%s1142_s30 + $0x40] sm:$0xff] %vm588_vm0, %v468_v26  ;;  %v470_v34 = vadd.f32 %v342_v31, %v214_v29  ;;  %v471_v35 = vadd.f32 %v343_v33, %v215_v32  ;;  %v344_v37 = vld [vmem:[%s1131_s3 + $0x60] sm:$0xff]  ;;  %v217_v38 = vld [vmem:[%s1125_s25 + $0x68] sm:$0xff]  ;;  %598 = vst.msk [vmem:[%s1142_s30 + $0x48] sm:$0xff] %vm588_vm0, %v469_v30 }
  0x52   : > { %v472_v39 = vadd.f32 %v344_v37, %v216_v36  ;;  %v345_v40 = vld [vmem:[%s1131_s3 + $0x68] sm:$0xff]  ;;  %v218_v41 = vld [vmem:[%s1125_s25 + $0x70] sm:$0xff]  ;;  %v219_v45 = vld [vmem:[%s1125_s25 + $0x78] sm:$0xff] }
  0x53   : > { %v346_v42 = vld [vmem:[%s1131_s3 + $0x70] sm:$0xff]  ;;  %599 = vst.msk [vmem:[%s1142_s30 + $0x50] sm:$0xff] %vm588_vm0, %v470_v34  ;;  %600 = vst.msk [vmem:[%s1142_s30 + $0x58] sm:$0xff] %vm588_vm0, %v471_v35  ;;  %v473_v43 = vadd.f32 %v345_v40, %v217_v38  ;;  %v347_v46 = vld [vmem:[%s1131_s3 + $0x78] sm:$0xff] }
  0x54   : > { %v474_v44 = vadd.f32 %v346_v42, %v218_v41  ;;  %v220_v47 = vld [vmem:[%s1125_s25 + $0x80] sm:$0xff]  ;;  %601 = vst.msk [vmem:[%s1142_s30 + $0x60] sm:$0xff] %vm588_vm0, %v472_v39  ;;  %v475_v48 = vadd.f32 %v347_v46, %v219_v45  ;;  %v221_v50 = vld [vmem:[%s1125_s25 + $0x88] sm:$0xff]  ;;  %v222_v54 = vld [vmem:[%s1125_s25 + $0x90] sm:$0xff] }
  0x55   : > { %v348_v49 = vld [vmem:[%s1131_s3 + $0x80] sm:$0xff]  ;;  %v349_v51 = vld [vmem:[%s1131_s3 + $0x88] sm:$0xff]  ;;  %602 = vst.msk [vmem:[%s1142_s30 + $0x68] sm:$0xff] %vm588_vm0, %v473_v43  ;;  %v350_v55 = vld [vmem:[%s1131_s3 + $0x90] sm:$0xff] }
  0x56   : > { %603 = vst.msk [vmem:[%s1142_s30 + $0x70] sm:$0xff] %vm588_vm0, %v474_v44  ;;  %v476_v52 = vadd.f32 %v348_v49, %v220_v47  ;;  %v477_v53 = vadd.f32 %v349_v51, %v221_v50  ;;  %v223_v56 = vld [vmem:[%s1125_s25 + $0x98] sm:$0xff]  ;;  %604 = vst.msk [vmem:[%s1142_s30 + $0x78] sm:$0xff] %vm588_vm0, %v475_v48  ;;  %v478_v57 = vadd.f32 %v350_v55, %v222_v54  ;;  %v224_v59 = vld [vmem:[%s1125_s25 + $0xa0] sm:$0xff] }
  0x57   : > { %v351_v58 = vld [vmem:[%s1131_s3 + $0x98] sm:$0xff]  ;;  %v352_v60 = vld [vmem:[%s1131_s3 + $0xa0] sm:$0xff]  ;;  %v225_v63 = vld [vmem:[%s1125_s25 + $0xa8] sm:$0xff] }
  0x58   : > { %605 = vst.msk [vmem:[%s1142_s30 + $0x80] sm:$0xff] %vm588_vm0, %v476_v52  ;;  %606 = vst.msk [vmem:[%s1142_s30 + $0x88] sm:$0xff] %vm588_vm0, %v477_v53  ;;  %v479_v61 = vadd.f32 %v351_v58, %v223_v56  ;;  %v480_v62 = vadd.f32 %v352_v60, %v224_v59  ;;  %v353_v0 = vld [vmem:[%s1131_s3 + $0xa8] sm:$0xff]  ;;  %v226_v1 = vld [vmem:[%s1125_s25 + $0xb0] sm:$0xff] }
  0x59   : > { %607 = vst.msk [vmem:[%s1142_s30 + $0x90] sm:$0xff] %vm588_vm0, %v478_v57  ;;  %v481_v2 = vadd.f32 %v353_v0, %v225_v63  ;;  %v354_v3 = vld [vmem:[%s1131_s3 + $0xb0] sm:$0xff]  ;;  %v227_v4 = vld [vmem:[%s1125_s25 + $0xb8] sm:$0xff]  ;;  %v228_v8 = vld [vmem:[%s1125_s25 + $0xc0] sm:$0xff] }
  0x5a   : > { %v355_v5 = vld [vmem:[%s1131_s3 + $0xb8] sm:$0xff]  ;;  %608 = vst.msk [vmem:[%s1142_s30 + $0x98] sm:$0xff] %vm588_vm0, %v479_v61  ;;  %609 = vst.msk [vmem:[%s1142_s30 + $0xa0] sm:$0xff] %vm588_vm0, %v480_v62  ;;  %v482_v6 = vadd.f32 %v354_v3, %v226_v1  ;;  %v356_v9 = vld [vmem:[%s1131_s3 + $0xc0] sm:$0xff] }
  0x5b   : > { %v483_v7 = vadd.f32 %v355_v5, %v227_v4  ;;  %v229_v10 = vld [vmem:[%s1125_s25 + $0xc8] sm:$0xff]  ;;  %610 = vst.msk [vmem:[%s1142_s30 + $0xa8] sm:$0xff] %vm588_vm0, %v481_v2  ;;  %v484_v11 = vadd.f32 %v356_v9, %v228_v8  ;;  %v230_v13 = vld [vmem:[%s1125_s25 + $0xd0] sm:$0xff]  ;;  %v231_v17 = vld [vmem:[%s1125_s25 + $0xd8] sm:$0xff] }
  0x5c   : > { %v357_v12 = vld [vmem:[%s1131_s3 + $0xc8] sm:$0xff]  ;;  %v358_v14 = vld [vmem:[%s1131_s3 + $0xd0] sm:$0xff]  ;;  %611 = vst.msk [vmem:[%s1142_s30 + $0xb0] sm:$0xff] %vm588_vm0, %v482_v6  ;;  %v359_v18 = vld [vmem:[%s1131_s3 + $0xd8] sm:$0xff] }
  0x5d   : > { %612 = vst.msk [vmem:[%s1142_s30 + $0xb8] sm:$0xff] %vm588_vm0, %v483_v7  ;;  %v485_v15 = vadd.f32 %v357_v12, %v229_v10  ;;  %v486_v16 = vadd.f32 %v358_v14, %v230_v13  ;;  %v232_v19 = vld [vmem:[%s1125_s25 + $0xe0] sm:$0xff]  ;;  %613 = vst.msk [vmem:[%s1142_s30 + $0xc0] sm:$0xff] %vm588_vm0, %v484_v11  ;;  %v487_v20 = vadd.f32 %v359_v18, %v231_v17  ;;  %v233_v22 = vld [vmem:[%s1125_s25 + $0xe8] sm:$0xff] }
  0x5e   : > { %v360_v21 = vld [vmem:[%s1131_s3 + $0xe0] sm:$0xff]  ;;  %v361_v23 = vld [vmem:[%s1131_s3 + $0xe8] sm:$0xff]  ;;  %v234_v26 = vld [vmem:[%s1125_s25 + $0xf0] sm:$0xff] }
  0x5f   : > { %614 = vst.msk [vmem:[%s1142_s30 + $0xc8] sm:$0xff] %vm588_vm0, %v485_v15  ;;  %615 = vst.msk [vmem:[%s1142_s30 + $0xd0] sm:$0xff] %vm588_vm0, %v486_v16  ;;  %v488_v24 = vadd.f32 %v360_v21, %v232_v19  ;;  %v489_v25 = vadd.f32 %v361_v23, %v233_v22  ;;  %v362_v27 = vld [vmem:[%s1131_s3 + $0xf0] sm:$0xff]  ;;  %v235_v28 = vld [vmem:[%s1125_s25 + $0xf8] sm:$0xff] }
  0x60   : > { %616 = vst.msk [vmem:[%s1142_s30 + $0xd8] sm:$0xff] %vm588_vm0, %v487_v20  ;;  %v490_v29 = vadd.f32 %v362_v27, %v234_v26  ;;  %v363_v30 = vld [vmem:[%s1131_s3 + $0xf8] sm:$0xff]  ;;  %v236_v31 = vld [vmem:[%s1125_s25 + $0x100] sm:$0xff]  ;;  %v237_v35 = vld [vmem:[%s1125_s25 + $0x108] sm:$0xff] }
  0x61   : > { %v364_v32 = vld [vmem:[%s1131_s3 + $0x100] sm:$0xff]  ;;  %617 = vst.msk [vmem:[%s1142_s30 + $0xe0] sm:$0xff] %vm588_vm0, %v488_v24  ;;  %618 = vst.msk [vmem:[%s1142_s30 + $0xe8] sm:$0xff] %vm588_vm0, %v489_v25  ;;  %v491_v33 = vadd.f32 %v363_v30, %v235_v28  ;;  %v365_v36 = vld [vmem:[%s1131_s3 + $0x108] sm:$0xff] }
  0x62   : > { %v492_v34 = vadd.f32 %v364_v32, %v236_v31  ;;  %v238_v37 = vld [vmem:[%s1125_s25 + $0x110] sm:$0xff]  ;;  %619 = vst.msk [vmem:[%s1142_s30 + $0xf0] sm:$0xff] %vm588_vm0, %v490_v29  ;;  %v493_v38 = vadd.f32 %v365_v36, %v237_v35  ;;  %v239_v40 = vld [vmem:[%s1125_s25 + $0x118] sm:$0xff]  ;;  %v240_v44 = vld [vmem:[%s1125_s25 + $0x120] sm:$0xff] }
  0x63   : > { %v366_v39 = vld [vmem:[%s1131_s3 + $0x110] sm:$0xff]  ;;  %v367_v41 = vld [vmem:[%s1131_s3 + $0x118] sm:$0xff]  ;;  %620 = vst.msk [vmem:[%s1142_s30 + $0xf8] sm:$0xff] %vm588_vm0, %v491_v33  ;;  %v368_v45 = vld [vmem:[%s1131_s3 + $0x120] sm:$0xff] }
  0x64   : > { %621 = vst.msk [vmem:[%s1142_s30 + $0x100] sm:$0xff] %vm588_vm0, %v492_v34  ;;  %v494_v42 = vadd.f32 %v366_v39, %v238_v37  ;;  %v495_v43 = vadd.f32 %v367_v41, %v239_v40  ;;  %v241_v46 = vld [vmem:[%s1125_s25 + $0x128] sm:$0xff]  ;;  %622 = vst.msk [vmem:[%s1142_s30 + $0x108] sm:$0xff] %vm588_vm0, %v493_v38  ;;  %v496_v47 = vadd.f32 %v368_v45, %v240_v44  ;;  %v242_v49 = vld [vmem:[%s1125_s25 + $0x130] sm:$0xff] }
  0x65   : > { %v369_v48 = vld [vmem:[%s1131_s3 + $0x128] sm:$0xff]  ;;  %v370_v50 = vld [vmem:[%s1131_s3 + $0x130] sm:$0xff]  ;;  %v243_v53 = vld [vmem:[%s1125_s25 + $0x138] sm:$0xff] }
  0x66   : > { %623 = vst.msk [vmem:[%s1142_s30 + $0x110] sm:$0xff] %vm588_vm0, %v494_v42  ;;  %624 = vst.msk [vmem:[%s1142_s30 + $0x118] sm:$0xff] %vm588_vm0, %v495_v43  ;;  %v497_v51 = vadd.f32 %v369_v48, %v241_v46  ;;  %v498_v52 = vadd.f32 %v370_v50, %v242_v49  ;;  %v371_v54 = vld [vmem:[%s1131_s3 + $0x138] sm:$0xff]  ;;  %v244_v55 = vld [vmem:[%s1125_s25 + $0x140] sm:$0xff] }
  0x67   : > { %625 = vst.msk [vmem:[%s1142_s30 + $0x120] sm:$0xff] %vm588_vm0, %v496_v47  ;;  %v499_v56 = vadd.f32 %v371_v54, %v243_v53  ;;  %v372_v57 = vld [vmem:[%s1131_s3 + $0x140] sm:$0xff]  ;;  %v245_v58 = vld [vmem:[%s1125_s25 + $0x148] sm:$0xff]  ;;  %v246_v62 = vld [vmem:[%s1125_s25 + $0x150] sm:$0xff] }
  0x68   : > { %v373_v59 = vld [vmem:[%s1131_s3 + $0x148] sm:$0xff]  ;;  %626 = vst.msk [vmem:[%s1142_s30 + $0x128] sm:$0xff] %vm588_vm0, %v497_v51  ;;  %627 = vst.msk [vmem:[%s1142_s30 + $0x130] sm:$0xff] %vm588_vm0, %v498_v52  ;;  %v500_v60 = vadd.f32 %v372_v57, %v244_v55  ;;  %v374_v63 = vld [vmem:[%s1131_s3 + $0x150] sm:$0xff] }
  0x69   : > { %v501_v61 = vadd.f32 %v373_v59, %v245_v58  ;;  %v247_v0 = vld [vmem:[%s1125_s25 + $0x158] sm:$0xff]  ;;  %628 = vst.msk [vmem:[%s1142_s30 + $0x138] sm:$0xff] %vm588_vm0, %v499_v56  ;;  %v502_v1 = vadd.f32 %v374_v63, %v246_v62  ;;  %v248_v3 = vld [vmem:[%s1125_s25 + $0x160] sm:$0xff]  ;;  %v249_v7 = vld [vmem:[%s1125_s25 + $0x168] sm:$0xff] }
  0x6a   : > { %v375_v2 = vld [vmem:[%s1131_s3 + $0x158] sm:$0xff]  ;;  %v376_v4 = vld [vmem:[%s1131_s3 + $0x160] sm:$0xff]  ;;  %629 = vst.msk [vmem:[%s1142_s30 + $0x140] sm:$0xff] %vm588_vm0, %v500_v60  ;;  %v377_v8 = vld [vmem:[%s1131_s3 + $0x168] sm:$0xff] }
  0x6b   : > { %630 = vst.msk [vmem:[%s1142_s30 + $0x148] sm:$0xff] %vm588_vm0, %v501_v61  ;;  %v503_v5 = vadd.f32 %v375_v2, %v247_v0  ;;  %v504_v6 = vadd.f32 %v376_v4, %v248_v3  ;;  %v250_v9 = vld [vmem:[%s1125_s25 + $0x170] sm:$0xff]  ;;  %631 = vst.msk [vmem:[%s1142_s30 + $0x150] sm:$0xff] %vm588_vm0, %v502_v1  ;;  %v505_v10 = vadd.f32 %v377_v8, %v249_v7  ;;  %v251_v12 = vld [vmem:[%s1125_s25 + $0x178] sm:$0xff] }
  0x6c   : > { %v378_v11 = vld [vmem:[%s1131_s3 + $0x170] sm:$0xff]  ;;  %v379_v13 = vld [vmem:[%s1131_s3 + $0x178] sm:$0xff]  ;;  %v252_v16 = vld [vmem:[%s1125_s25 + $0x180] sm:$0xff] }
  0x6d   : > { %632 = vst.msk [vmem:[%s1142_s30 + $0x158] sm:$0xff] %vm588_vm0, %v503_v5  ;;  %633 = vst.msk [vmem:[%s1142_s30 + $0x160] sm:$0xff] %vm588_vm0, %v504_v6  ;;  %v506_v14 = vadd.f32 %v378_v11, %v250_v9  ;;  %v507_v15 = vadd.f32 %v379_v13, %v251_v12  ;;  %v380_v17 = vld [vmem:[%s1131_s3 + $0x180] sm:$0xff]  ;;  %v253_v18 = vld [vmem:[%s1125_s25 + $0x188] sm:$0xff] }
  0x6e   : > { %634 = vst.msk [vmem:[%s1142_s30 + $0x168] sm:$0xff] %vm588_vm0, %v505_v10  ;;  %v508_v19 = vadd.f32 %v380_v17, %v252_v16  ;;  %v381_v20 = vld [vmem:[%s1131_s3 + $0x188] sm:$0xff]  ;;  %v254_v21 = vld [vmem:[%s1125_s25 + $0x190] sm:$0xff]  ;;  %v255_v25 = vld [vmem:[%s1125_s25 + $0x198] sm:$0xff] }
  0x6f   : > { %v382_v22 = vld [vmem:[%s1131_s3 + $0x190] sm:$0xff]  ;;  %635 = vst.msk [vmem:[%s1142_s30 + $0x170] sm:$0xff] %vm588_vm0, %v506_v14  ;;  %636 = vst.msk [vmem:[%s1142_s30 + $0x178] sm:$0xff] %vm588_vm0, %v507_v15  ;;  %v509_v23 = vadd.f32 %v381_v20, %v253_v18  ;;  %v383_v26 = vld [vmem:[%s1131_s3 + $0x198] sm:$0xff] }
  0x70   : > { %v510_v24 = vadd.f32 %v382_v22, %v254_v21  ;;  %v256_v27 = vld [vmem:[%s1125_s25 + $0x1a0] sm:$0xff]  ;;  %637 = vst.msk [vmem:[%s1142_s30 + $0x180] sm:$0xff] %vm588_vm0, %v508_v19  ;;  %v511_v28 = vadd.f32 %v383_v26, %v255_v25  ;;  %v257_v30 = vld [vmem:[%s1125_s25 + $0x1a8] sm:$0xff]  ;;  %v258_v34 = vld [vmem:[%s1125_s25 + $0x1b0] sm:$0xff] }
  0x71   : > { %v384_v29 = vld [vmem:[%s1131_s3 + $0x1a0] sm:$0xff]  ;;  %v385_v31 = vld [vmem:[%s1131_s3 + $0x1a8] sm:$0xff]  ;;  %638 = vst.msk [vmem:[%s1142_s30 + $0x188] sm:$0xff] %vm588_vm0, %v509_v23  ;;  %v386_v35 = vld [vmem:[%s1131_s3 + $0x1b0] sm:$0xff] }
  0x72   : > { %639 = vst.msk [vmem:[%s1142_s30 + $0x190] sm:$0xff] %vm588_vm0, %v510_v24  ;;  %v512_v32 = vadd.f32 %v384_v29, %v256_v27  ;;  %v513_v33 = vadd.f32 %v385_v31, %v257_v30  ;;  %v259_v36 = vld [vmem:[%s1125_s25 + $0x1b8] sm:$0xff]  ;;  %640 = vst.msk [vmem:[%s1142_s30 + $0x198] sm:$0xff] %vm588_vm0, %v511_v28  ;;  %v514_v37 = vadd.f32 %v386_v35, %v258_v34  ;;  %v260_v39 = vld [vmem:[%s1125_s25 + $0x1c0] sm:$0xff] }
  0x73   : > { %v387_v38 = vld [vmem:[%s1131_s3 + $0x1b8] sm:$0xff]  ;;  %v388_v40 = vld [vmem:[%s1131_s3 + $0x1c0] sm:$0xff]  ;;  %v261_v43 = vld [vmem:[%s1125_s25 + $0x1c8] sm:$0xff] }
  0x74   : > { %641 = vst.msk [vmem:[%s1142_s30 + $0x1a0] sm:$0xff] %vm588_vm0, %v512_v32  ;;  %642 = vst.msk [vmem:[%s1142_s30 + $0x1a8] sm:$0xff] %vm588_vm0, %v513_v33  ;;  %v515_v41 = vadd.f32 %v387_v38, %v259_v36  ;;  %v516_v42 = vadd.f32 %v388_v40, %v260_v39  ;;  %v389_v44 = vld [vmem:[%s1131_s3 + $0x1c8] sm:$0xff]  ;;  %v262_v45 = vld [vmem:[%s1125_s25 + $0x1d0] sm:$0xff] }
  0x75   : > { %643 = vst.msk [vmem:[%s1142_s30 + $0x1b0] sm:$0xff] %vm588_vm0, %v514_v37  ;;  %v517_v46 = vadd.f32 %v389_v44, %v261_v43  ;;  %v390_v47 = vld [vmem:[%s1131_s3 + $0x1d0] sm:$0xff]  ;;  %v263_v48 = vld [vmem:[%s1125_s25 + $0x1d8] sm:$0xff]  ;;  %v264_v52 = vld [vmem:[%s1125_s25 + $0x1e0] sm:$0xff] }
  0x76   : > { %v391_v49 = vld [vmem:[%s1131_s3 + $0x1d8] sm:$0xff]  ;;  %644 = vst.msk [vmem:[%s1142_s30 + $0x1b8] sm:$0xff] %vm588_vm0, %v515_v41  ;;  %645 = vst.msk [vmem:[%s1142_s30 + $0x1c0] sm:$0xff] %vm588_vm0, %v516_v42  ;;  %v518_v50 = vadd.f32 %v390_v47, %v262_v45  ;;  %v392_v53 = vld [vmem:[%s1131_s3 + $0x1e0] sm:$0xff] }
  0x77   : > { %v519_v51 = vadd.f32 %v391_v49, %v263_v48  ;;  %v265_v54 = vld [vmem:[%s1125_s25 + $0x1e8] sm:$0xff]  ;;  %646 = vst.msk [vmem:[%s1142_s30 + $0x1c8] sm:$0xff] %vm588_vm0, %v517_v46  ;;  %v520_v55 = vadd.f32 %v392_v53, %v264_v52  ;;  %v266_v57 = vld [vmem:[%s1125_s25 + $0x1f0] sm:$0xff]  ;;  %v267_v61 = vld [vmem:[%s1125_s25 + $0x1f8] sm:$0xff] }
  0x78   : > { %v393_v56 = vld [vmem:[%s1131_s3 + $0x1e8] sm:$0xff]  ;;  %v394_v58 = vld [vmem:[%s1131_s3 + $0x1f0] sm:$0xff]  ;;  %647 = vst.msk [vmem:[%s1142_s30 + $0x1d0] sm:$0xff] %vm588_vm0, %v518_v50  ;;  %v395_v62 = vld [vmem:[%s1131_s3 + $0x1f8] sm:$0xff] }
  0x79   : > { %648 = vst.msk [vmem:[%s1142_s30 + $0x1d8] sm:$0xff] %vm588_vm0, %v519_v51  ;;  %v521_v59 = vadd.f32 %v393_v56, %v265_v54  ;;  %v522_v60 = vadd.f32 %v394_v58, %v266_v57  ;;  %v268_v63 = vld [vmem:[%s1125_s25 + $0x200] sm:$0xff]  ;;  %649 = vst.msk [vmem:[%s1142_s30 + $0x1e0] sm:$0xff] %vm588_vm0, %v520_v55  ;;  %v523_v0 = vadd.f32 %v395_v62, %v267_v61  ;;  %v269_v2 = vld [vmem:[%s1125_s25 + $0x208] sm:$0xff] }
  0x7a   : > { %v396_v1 = vld [vmem:[%s1131_s3 + $0x200] sm:$0xff]  ;;  %v397_v3 = vld [vmem:[%s1131_s3 + $0x208] sm:$0xff]  ;;  %v270_v6 = vld [vmem:[%s1125_s25 + $0x210] sm:$0xff] }
  0x7b   : > { %650 = vst.msk [vmem:[%s1142_s30 + $0x1e8] sm:$0xff] %vm588_vm0, %v521_v59  ;;  %651 = vst.msk [vmem:[%s1142_s30 + $0x1f0] sm:$0xff] %vm588_vm0, %v522_v60  ;;  %v524_v4 = vadd.f32 %v396_v1, %v268_v63  ;;  %v525_v5 = vadd.f32 %v397_v3, %v269_v2  ;;  %v398_v7 = vld [vmem:[%s1131_s3 + $0x210] sm:$0xff]  ;;  %v271_v8 = vld [vmem:[%s1125_s25 + $0x218] sm:$0xff] }
  0x7c   : > { %652 = vst.msk [vmem:[%s1142_s30 + $0x1f8] sm:$0xff] %vm588_vm0, %v523_v0  ;;  %v526_v9 = vadd.f32 %v398_v7, %v270_v6  ;;  %v399_v10 = vld [vmem:[%s1131_s3 + $0x218] sm:$0xff]  ;;  %v272_v11 = vld [vmem:[%s1125_s25 + $0x220] sm:$0xff]  ;;  %v273_v15 = vld [vmem:[%s1125_s25 + $0x228] sm:$0xff] }
  0x7d   : > { %v400_v12 = vld [vmem:[%s1131_s3 + $0x220] sm:$0xff]  ;;  %653 = vst.msk [vmem:[%s1142_s30 + $0x200] sm:$0xff] %vm588_vm0, %v524_v4  ;;  %654 = vst.msk [vmem:[%s1142_s30 + $0x208] sm:$0xff] %vm588_vm0, %v525_v5  ;;  %v527_v13 = vadd.f32 %v399_v10, %v271_v8  ;;  %v401_v16 = vld [vmem:[%s1131_s3 + $0x228] sm:$0xff] }
  0x7e   : > { %v528_v14 = vadd.f32 %v400_v12, %v272_v11  ;;  %v274_v17 = vld [vmem:[%s1125_s25 + $0x230] sm:$0xff]  ;;  %655 = vst.msk [vmem:[%s1142_s30 + $0x210] sm:$0xff] %vm588_vm0, %v526_v9  ;;  %v529_v18 = vadd.f32 %v401_v16, %v273_v15  ;;  %v275_v20 = vld [vmem:[%s1125_s25 + $0x238] sm:$0xff]  ;;  %v276_v24 = vld [vmem:[%s1125_s25 + $0x240] sm:$0xff] }
  0x7f   : > { %v402_v19 = vld [vmem:[%s1131_s3 + $0x230] sm:$0xff]  ;;  %v403_v21 = vld [vmem:[%s1131_s3 + $0x238] sm:$0xff]  ;;  %656 = vst.msk [vmem:[%s1142_s30 + $0x218] sm:$0xff] %vm588_vm0, %v527_v13  ;;  %v404_v25 = vld [vmem:[%s1131_s3 + $0x240] sm:$0xff] }
  0x80   : > { %657 = vst.msk [vmem:[%s1142_s30 + $0x220] sm:$0xff] %vm588_vm0, %v528_v14  ;;  %v530_v22 = vadd.f32 %v402_v19, %v274_v17  ;;  %v531_v23 = vadd.f32 %v403_v21, %v275_v20  ;;  %v277_v26 = vld [vmem:[%s1125_s25 + $0x248] sm:$0xff]  ;;  %658 = vst.msk [vmem:[%s1142_s30 + $0x228] sm:$0xff] %vm588_vm0, %v529_v18  ;;  %v532_v27 = vadd.f32 %v404_v25, %v276_v24  ;;  %v278_v29 = vld [vmem:[%s1125_s25 + $0x250] sm:$0xff] }
  0x81   : > { %v405_v28 = vld [vmem:[%s1131_s3 + $0x248] sm:$0xff]  ;;  %v406_v30 = vld [vmem:[%s1131_s3 + $0x250] sm:$0xff]  ;;  %v279_v33 = vld [vmem:[%s1125_s25 + $0x258] sm:$0xff] }
  0x82   : > { %659 = vst.msk [vmem:[%s1142_s30 + $0x230] sm:$0xff] %vm588_vm0, %v530_v22  ;;  %660 = vst.msk [vmem:[%s1142_s30 + $0x238] sm:$0xff] %vm588_vm0, %v531_v23  ;;  %v533_v31 = vadd.f32 %v405_v28, %v277_v26  ;;  %v534_v32 = vadd.f32 %v406_v30, %v278_v29  ;;  %v407_v34 = vld [vmem:[%s1131_s3 + $0x258] sm:$0xff]  ;;  %v280_v35 = vld [vmem:[%s1125_s25 + $0x260] sm:$0xff] }
  0x83   : > { %661 = vst.msk [vmem:[%s1142_s30 + $0x240] sm:$0xff] %vm588_vm0, %v532_v27  ;;  %v535_v36 = vadd.f32 %v407_v34, %v279_v33  ;;  %v408_v37 = vld [vmem:[%s1131_s3 + $0x260] sm:$0xff]  ;;  %v281_v38 = vld [vmem:[%s1125_s25 + $0x268] sm:$0xff]  ;;  %v282_v42 = vld [vmem:[%s1125_s25 + $0x270] sm:$0xff] }
  0x84   : > { %v409_v39 = vld [vmem:[%s1131_s3 + $0x268] sm:$0xff]  ;;  %662 = vst.msk [vmem:[%s1142_s30 + $0x248] sm:$0xff] %vm588_vm0, %v533_v31  ;;  %663 = vst.msk [vmem:[%s1142_s30 + $0x250] sm:$0xff] %vm588_vm0, %v534_v32  ;;  %v536_v40 = vadd.f32 %v408_v37, %v280_v35  ;;  %v410_v43 = vld [vmem:[%s1131_s3 + $0x270] sm:$0xff] }
  0x85   : > { %v537_v41 = vadd.f32 %v409_v39, %v281_v38  ;;  %v283_v44 = vld [vmem:[%s1125_s25 + $0x278] sm:$0xff]  ;;  %664 = vst.msk [vmem:[%s1142_s30 + $0x258] sm:$0xff] %vm588_vm0, %v535_v36  ;;  %v538_v45 = vadd.f32 %v410_v43, %v282_v42  ;;  %v284_v47 = vld [vmem:[%s1125_s25 + $0x280] sm:$0xff]  ;;  %v285_v51 = vld [vmem:[%s1125_s25 + $0x288] sm:$0xff] }
  0x86   : > { %v411_v46 = vld [vmem:[%s1131_s3 + $0x278] sm:$0xff]  ;;  %v412_v48 = vld [vmem:[%s1131_s3 + $0x280] sm:$0xff]  ;;  %665 = vst.msk [vmem:[%s1142_s30 + $0x260] sm:$0xff] %vm588_vm0, %v536_v40  ;;  %v413_v52 = vld [vmem:[%s1131_s3 + $0x288] sm:$0xff] }
  0x87   : > { %666 = vst.msk [vmem:[%s1142_s30 + $0x268] sm:$0xff] %vm588_vm0, %v537_v41  ;;  %v539_v49 = vadd.f32 %v411_v46, %v283_v44  ;;  %v540_v50 = vadd.f32 %v412_v48, %v284_v47  ;;  %v286_v53 = vld [vmem:[%s1125_s25 + $0x290] sm:$0xff]  ;;  %667 = vst.msk [vmem:[%s1142_s30 + $0x270] sm:$0xff] %vm588_vm0, %v538_v45  ;;  %v541_v54 = vadd.f32 %v413_v52, %v285_v51  ;;  %v287_v56 = vld [vmem:[%s1125_s25 + $0x298] sm:$0xff] }
  0x88   : > { %v414_v55 = vld [vmem:[%s1131_s3 + $0x290] sm:$0xff]  ;;  %v415_v57 = vld [vmem:[%s1131_s3 + $0x298] sm:$0xff]  ;;  %v288_v60 = vld [vmem:[%s1125_s25 + $0x2a0] sm:$0xff] }
  0x89   : > { %668 = vst.msk [vmem:[%s1142_s30 + $0x278] sm:$0xff] %vm588_vm0, %v539_v49  ;;  %669 = vst.msk [vmem:[%s1142_s30 + $0x280] sm:$0xff] %vm588_vm0, %v540_v50  ;;  %v542_v58 = vadd.f32 %v414_v55, %v286_v53  ;;  %v543_v59 = vadd.f32 %v415_v57, %v287_v56  ;;  %v416_v61 = vld [vmem:[%s1131_s3 + $0x2a0] sm:$0xff]  ;;  %v289_v62 = vld [vmem:[%s1125_s25 + $0x2a8] sm:$0xff] }
  0x8a   : > { %670 = vst.msk [vmem:[%s1142_s30 + $0x288] sm:$0xff] %vm588_vm0, %v541_v54  ;;  %v544_v63 = vadd.f32 %v416_v61, %v288_v60  ;;  %v417_v0 = vld [vmem:[%s1131_s3 + $0x2a8] sm:$0xff]  ;;  %v290_v1 = vld [vmem:[%s1125_s25 + $0x2b0] sm:$0xff]  ;;  %v291_v5 = vld [vmem:[%s1125_s25 + $0x2b8] sm:$0xff] }
  0x8b   : > { %v418_v2 = vld [vmem:[%s1131_s3 + $0x2b0] sm:$0xff]  ;;  %671 = vst.msk [vmem:[%s1142_s30 + $0x290] sm:$0xff] %vm588_vm0, %v542_v58  ;;  %672 = vst.msk [vmem:[%s1142_s30 + $0x298] sm:$0xff] %vm588_vm0, %v543_v59  ;;  %v545_v3 = vadd.f32 %v417_v0, %v289_v62  ;;  %v419_v6 = vld [vmem:[%s1131_s3 + $0x2b8] sm:$0xff] }
  0x8c   : > { %v546_v4 = vadd.f32 %v418_v2, %v290_v1  ;;  %v292_v7 = vld [vmem:[%s1125_s25 + $0x2c0] sm:$0xff]  ;;  %673 = vst.msk [vmem:[%s1142_s30 + $0x2a0] sm:$0xff] %vm588_vm0, %v544_v63  ;;  %v547_v8 = vadd.f32 %v419_v6, %v291_v5  ;;  %v293_v10 = vld [vmem:[%s1125_s25 + $0x2c8] sm:$0xff]  ;;  %v294_v14 = vld [vmem:[%s1125_s25 + $0x2d0] sm:$0xff] }
  0x8d   : > { %v420_v9 = vld [vmem:[%s1131_s3 + $0x2c0] sm:$0xff]  ;;  %v421_v11 = vld [vmem:[%s1131_s3 + $0x2c8] sm:$0xff]  ;;  %674 = vst.msk [vmem:[%s1142_s30 + $0x2a8] sm:$0xff] %vm588_vm0, %v545_v3  ;;  %v422_v15 = vld [vmem:[%s1131_s3 + $0x2d0] sm:$0xff] }
  0x8e   : > { %675 = vst.msk [vmem:[%s1142_s30 + $0x2b0] sm:$0xff] %vm588_vm0, %v546_v4  ;;  %v548_v12 = vadd.f32 %v420_v9, %v292_v7  ;;  %v549_v13 = vadd.f32 %v421_v11, %v293_v10  ;;  %v295_v16 = vld [vmem:[%s1125_s25 + $0x2d8] sm:$0xff]  ;;  %676 = vst.msk [vmem:[%s1142_s30 + $0x2b8] sm:$0xff] %vm588_vm0, %v547_v8  ;;  %v550_v17 = vadd.f32 %v422_v15, %v294_v14  ;;  %v296_v19 = vld [vmem:[%s1125_s25 + $0x2e0] sm:$0xff] }
  0x8f   : > { %v423_v18 = vld [vmem:[%s1131_s3 + $0x2d8] sm:$0xff]  ;;  %v424_v20 = vld [vmem:[%s1131_s3 + $0x2e0] sm:$0xff]  ;;  %v297_v23 = vld [vmem:[%s1125_s25 + $0x2e8] sm:$0xff] }
  0x90   : > { %677 = vst.msk [vmem:[%s1142_s30 + $0x2c0] sm:$0xff] %vm588_vm0, %v548_v12  ;;  %678 = vst.msk [vmem:[%s1142_s30 + $0x2c8] sm:$0xff] %vm588_vm0, %v549_v13  ;;  %v551_v21 = vadd.f32 %v423_v18, %v295_v16  ;;  %v552_v22 = vadd.f32 %v424_v20, %v296_v19  ;;  %v425_v24 = vld [vmem:[%s1131_s3 + $0x2e8] sm:$0xff]  ;;  %v298_v25 = vld [vmem:[%s1125_s25 + $0x2f0] sm:$0xff] }
  0x91   : > { %679 = vst.msk [vmem:[%s1142_s30 + $0x2d0] sm:$0xff] %vm588_vm0, %v550_v17  ;;  %v553_v26 = vadd.f32 %v425_v24, %v297_v23  ;;  %v426_v27 = vld [vmem:[%s1131_s3 + $0x2f0] sm:$0xff]  ;;  %v299_v28 = vld [vmem:[%s1125_s25 + $0x2f8] sm:$0xff]  ;;  %v300_v32 = vld [vmem:[%s1125_s25 + $0x300] sm:$0xff] }
  0x92   : > { %v427_v29 = vld [vmem:[%s1131_s3 + $0x2f8] sm:$0xff]  ;;  %680 = vst.msk [vmem:[%s1142_s30 + $0x2d8] sm:$0xff] %vm588_vm0, %v551_v21  ;;  %681 = vst.msk [vmem:[%s1142_s30 + $0x2e0] sm:$0xff] %vm588_vm0, %v552_v22  ;;  %v554_v30 = vadd.f32 %v426_v27, %v298_v25  ;;  %v428_v33 = vld [vmem:[%s1131_s3 + $0x300] sm:$0xff] }
  0x93   : > { %v555_v31 = vadd.f32 %v427_v29, %v299_v28  ;;  %v301_v34 = vld [vmem:[%s1125_s25 + $0x308] sm:$0xff]  ;;  %682 = vst.msk [vmem:[%s1142_s30 + $0x2e8] sm:$0xff] %vm588_vm0, %v553_v26  ;;  %v556_v35 = vadd.f32 %v428_v33, %v300_v32  ;;  %v302_v37 = vld [vmem:[%s1125_s25 + $0x310] sm:$0xff]  ;;  %v303_v41 = vld [vmem:[%s1125_s25 + $0x318] sm:$0xff] }
  0x94   : > { %v429_v36 = vld [vmem:[%s1131_s3 + $0x308] sm:$0xff]  ;;  %v430_v38 = vld [vmem:[%s1131_s3 + $0x310] sm:$0xff]  ;;  %683 = vst.msk [vmem:[%s1142_s30 + $0x2f0] sm:$0xff] %vm588_vm0, %v554_v30  ;;  %v431_v42 = vld [vmem:[%s1131_s3 + $0x318] sm:$0xff] }
  0x95   : > { %684 = vst.msk [vmem:[%s1142_s30 + $0x2f8] sm:$0xff] %vm588_vm0, %v555_v31  ;;  %v557_v39 = vadd.f32 %v429_v36, %v301_v34  ;;  %v558_v40 = vadd.f32 %v430_v38, %v302_v37  ;;  %v304_v43 = vld [vmem:[%s1125_s25 + $0x320] sm:$0xff]  ;;  %685 = vst.msk [vmem:[%s1142_s30 + $0x300] sm:$0xff] %vm588_vm0, %v556_v35  ;;  %v559_v44 = vadd.f32 %v431_v42, %v303_v41  ;;  %v305_v46 = vld [vmem:[%s1125_s25 + $0x328] sm:$0xff] }
  0x96   : > { %v432_v45 = vld [vmem:[%s1131_s3 + $0x320] sm:$0xff]  ;;  %v433_v47 = vld [vmem:[%s1131_s3 + $0x328] sm:$0xff]  ;;  %v306_v50 = vld [vmem:[%s1125_s25 + $0x330] sm:$0xff] }
  0x97   : > { %686 = vst.msk [vmem:[%s1142_s30 + $0x308] sm:$0xff] %vm588_vm0, %v557_v39  ;;  %687 = vst.msk [vmem:[%s1142_s30 + $0x310] sm:$0xff] %vm588_vm0, %v558_v40  ;;  %v560_v48 = vadd.f32 %v432_v45, %v304_v43  ;;  %v561_v49 = vadd.f32 %v433_v47, %v305_v46  ;;  %v434_v51 = vld [vmem:[%s1131_s3 + $0x330] sm:$0xff]  ;;  %v307_v52 = vld [vmem:[%s1125_s25 + $0x338] sm:$0xff] }
  0x98   : > { %688 = vst.msk [vmem:[%s1142_s30 + $0x318] sm:$0xff] %vm588_vm0, %v559_v44  ;;  %v562_v53 = vadd.f32 %v434_v51, %v306_v50  ;;  %v435_v54 = vld [vmem:[%s1131_s3 + $0x338] sm:$0xff]  ;;  %v308_v55 = vld [vmem:[%s1125_s25 + $0x340] sm:$0xff]  ;;  %v309_v59 = vld [vmem:[%s1125_s25 + $0x348] sm:$0xff] }
  0x99   : > { %v436_v56 = vld [vmem:[%s1131_s3 + $0x340] sm:$0xff]  ;;  %689 = vst.msk [vmem:[%s1142_s30 + $0x320] sm:$0xff] %vm588_vm0, %v560_v48  ;;  %690 = vst.msk [vmem:[%s1142_s30 + $0x328] sm:$0xff] %vm588_vm0, %v561_v49  ;;  %v563_v57 = vadd.f32 %v435_v54, %v307_v52  ;;  %v437_v60 = vld [vmem:[%s1131_s3 + $0x348] sm:$0xff] }
  0x9a   : > { %v564_v58 = vadd.f32 %v436_v56, %v308_v55  ;;  %v310_v61 = vld [vmem:[%s1125_s25 + $0x350] sm:$0xff]  ;;  %691 = vst.msk [vmem:[%s1142_s30 + $0x330] sm:$0xff] %vm588_vm0, %v562_v53  ;;  %v565_v62 = vadd.f32 %v437_v60, %v309_v59  ;;  %v311_v0 = vld [vmem:[%s1125_s25 + $0x358] sm:$0xff]  ;;  %v312_v4 = vld [vmem:[%s1125_s25 + $0x360] sm:$0xff] }
  0x9b   : > { %v438_v63 = vld [vmem:[%s1131_s3 + $0x350] sm:$0xff]  ;;  %v439_v1 = vld [vmem:[%s1131_s3 + $0x358] sm:$0xff]  ;;  %692 = vst.msk [vmem:[%s1142_s30 + $0x338] sm:$0xff] %vm588_vm0, %v563_v57  ;;  %v440_v5 = vld [vmem:[%s1131_s3 + $0x360] sm:$0xff] }
  0x9c   : > { %693 = vst.msk [vmem:[%s1142_s30 + $0x340] sm:$0xff] %vm588_vm0, %v564_v58  ;;  %v566_v2 = vadd.f32 %v438_v63, %v310_v61  ;;  %v567_v3 = vadd.f32 %v439_v1, %v311_v0  ;;  %v313_v6 = vld [vmem:[%s1125_s25 + $0x368] sm:$0xff]  ;;  %694 = vst.msk [vmem:[%s1142_s30 + $0x348] sm:$0xff] %vm588_vm0, %v565_v62  ;;  %v568_v7 = vadd.f32 %v440_v5, %v312_v4  ;;  %v314_v9 = vld [vmem:[%s1125_s25 + $0x370] sm:$0xff] }
  0x9d   : > { %v441_v8 = vld [vmem:[%s1131_s3 + $0x368] sm:$0xff]  ;;  %v442_v10 = vld [vmem:[%s1131_s3 + $0x370] sm:$0xff]  ;;  %v315_v13 = vld [vmem:[%s1125_s25 + $0x378] sm:$0xff] }
  0x9e   : > { %695 = vst.msk [vmem:[%s1142_s30 + $0x350] sm:$0xff] %vm588_vm0, %v566_v2  ;;  %696 = vst.msk [vmem:[%s1142_s30 + $0x358] sm:$0xff] %vm588_vm0, %v567_v3  ;;  %v569_v11 = vadd.f32 %v441_v8, %v313_v6  ;;  %v570_v12 = vadd.f32 %v442_v10, %v314_v9  ;;  %v443_v14 = vld [vmem:[%s1131_s3 + $0x378] sm:$0xff]  ;;  %v316_v15 = vld [vmem:[%s1125_s25 + $0x380] sm:$0xff] }
  0x9f   : > { %697 = vst.msk [vmem:[%s1142_s30 + $0x360] sm:$0xff] %vm588_vm0, %v568_v7  ;;  %v571_v16 = vadd.f32 %v443_v14, %v315_v13  ;;  %v444_v17 = vld [vmem:[%s1131_s3 + $0x380] sm:$0xff]  ;;  %v317_v18 = vld [vmem:[%s1125_s25 + $0x388] sm:$0xff]  ;;  %v318_v22 = vld [vmem:[%s1125_s25 + $0x390] sm:$0xff] }
  0xa0   : > { %v445_v19 = vld [vmem:[%s1131_s3 + $0x388] sm:$0xff]  ;;  %698 = vst.msk [vmem:[%s1142_s30 + $0x368] sm:$0xff] %vm588_vm0, %v569_v11  ;;  %699 = vst.msk [vmem:[%s1142_s30 + $0x370] sm:$0xff] %vm588_vm0, %v570_v12  ;;  %v572_v20 = vadd.f32 %v444_v17, %v316_v15  ;;  %v446_v23 = vld [vmem:[%s1131_s3 + $0x390] sm:$0xff] }
  0xa1   : > { %v573_v21 = vadd.f32 %v445_v19, %v317_v18  ;;  %v319_v24 = vld [vmem:[%s1125_s25 + $0x398] sm:$0xff]  ;;  %700 = vst.msk [vmem:[%s1142_s30 + $0x378] sm:$0xff] %vm588_vm0, %v571_v16  ;;  %v574_v25 = vadd.f32 %v446_v23, %v318_v22  ;;  %v320_v27 = vld [vmem:[%s1125_s25 + $0x3a0] sm:$0xff]  ;;  %v321_v31 = vld [vmem:[%s1125_s25 + $0x3a8] sm:$0xff] }
  0xa2   : > { %v447_v26 = vld [vmem:[%s1131_s3 + $0x398] sm:$0xff]  ;;  %v448_v28 = vld [vmem:[%s1131_s3 + $0x3a0] sm:$0xff]  ;;  %701 = vst.msk [vmem:[%s1142_s30 + $0x380] sm:$0xff] %vm588_vm0, %v572_v20  ;;  %v449_v32 = vld [vmem:[%s1131_s3 + $0x3a8] sm:$0xff] }
  0xa3   : > { %702 = vst.msk [vmem:[%s1142_s30 + $0x388] sm:$0xff] %vm588_vm0, %v573_v21  ;;  %v575_v29 = vadd.f32 %v447_v26, %v319_v24  ;;  %v576_v30 = vadd.f32 %v448_v28, %v320_v27  ;;  %v322_v33 = vld [vmem:[%s1125_s25 + $0x3b0] sm:$0xff]  ;;  %703 = vst.msk [vmem:[%s1142_s30 + $0x390] sm:$0xff] %vm588_vm0, %v574_v25  ;;  %v577_v34 = vadd.f32 %v449_v32, %v321_v31  ;;  %v323_v36 = vld [vmem:[%s1125_s25 + $0x3b8] sm:$0xff] }
  0xa4   : > { %v450_v35 = vld [vmem:[%s1131_s3 + $0x3b0] sm:$0xff]  ;;  %v451_v37 = vld [vmem:[%s1131_s3 + $0x3b8] sm:$0xff]  ;;  %v324_v40 = vld [vmem:[%s1125_s25 + $0x3c0] sm:$0xff] }
  0xa5   : > { %704 = vst.msk [vmem:[%s1142_s30 + $0x398] sm:$0xff] %vm588_vm0, %v575_v29  ;;  %705 = vst.msk [vmem:[%s1142_s30 + $0x3a0] sm:$0xff] %vm588_vm0, %v576_v30  ;;  %v578_v38 = vadd.f32 %v450_v35, %v322_v33  ;;  %v579_v39 = vadd.f32 %v451_v37, %v323_v36  ;;  %v452_v41 = vld [vmem:[%s1131_s3 + $0x3c0] sm:$0xff]  ;;  %v325_v42 = vld [vmem:[%s1125_s25 + $0x3c8] sm:$0xff] }
  0xa6   : > { %706 = vst.msk [vmem:[%s1142_s30 + $0x3a8] sm:$0xff] %vm588_vm0, %v577_v34  ;;  %v580_v43 = vadd.f32 %v452_v41, %v324_v40  ;;  %v453_v44 = vld [vmem:[%s1131_s3 + $0x3c8] sm:$0xff]  ;;  %v326_v45 = vld [vmem:[%s1125_s25 + $0x3d0] sm:$0xff]  ;;  %v327_v49 = vld [vmem:[%s1125_s25 + $0x3d8] sm:$0xff] }
  0xa7   : > { %v454_v46 = vld [vmem:[%s1131_s3 + $0x3d0] sm:$0xff]  ;;  %707 = vst.msk [vmem:[%s1142_s30 + $0x3b0] sm:$0xff] %vm588_vm0, %v578_v38  ;;  %708 = vst.msk [vmem:[%s1142_s30 + $0x3b8] sm:$0xff] %vm588_vm0, %v579_v39  ;;  %v581_v47 = vadd.f32 %v453_v44, %v325_v42  ;;  %v455_v50 = vld [vmem:[%s1131_s3 + $0x3d8] sm:$0xff] }
  0xa8   : > { %v582_v48 = vadd.f32 %v454_v46, %v326_v45  ;;  %v328_v51 = vld [vmem:[%s1125_s25 + $0x3e0] sm:$0xff]  ;;  %709 = vst.msk [vmem:[%s1142_s30 + $0x3c0] sm:$0xff] %vm588_vm0, %v580_v43  ;;  %v583_v52 = vadd.f32 %v455_v50, %v327_v49  ;;  %v329_v54 = vld [vmem:[%s1125_s25 + $0x3e8] sm:$0xff]  ;;  %v330_v58 = vld [vmem:[%s1125_s25 + $0x3f0] sm:$0xff] }
  0xa9   : > { %v456_v53 = vld [vmem:[%s1131_s3 + $0x3e0] sm:$0xff]  ;;  %v457_v55 = vld [vmem:[%s1131_s3 + $0x3e8] sm:$0xff]  ;;  %710 = vst.msk [vmem:[%s1142_s30 + $0x3c8] sm:$0xff] %vm588_vm0, %v581_v47  ;;  %v458_v59 = vld [vmem:[%s1131_s3 + $0x3f0] sm:$0xff] }
  0xaa   : > { %711 = vst.msk [vmem:[%s1142_s30 + $0x3d0] sm:$0xff] %vm588_vm0, %v582_v48  ;;  %v584_v56 = vadd.f32 %v456_v53, %v328_v51  ;;  %v585_v57 = vadd.f32 %v457_v55, %v329_v54  ;;  %v331_v60 = vld [vmem:[%s1125_s25 + $0x3f8] sm:$0xff]  ;;  %712 = vst.msk [vmem:[%s1142_s30 + $0x3d8] sm:$0xff] %vm588_vm0, %v583_v52  ;;  %v586_v61 = vadd.f32 %v458_v59, %v330_v58 }
  0xab   : > { %v459_v62 = vld [vmem:[%s1131_s3 + $0x3f8] sm:$0xff] }
  0xac   : > { %713 = vst.msk [vmem:[%s1142_s30 + $0x3e0] sm:$0xff] %vm588_vm0, %v584_v56  ;;  %714 = vst.msk [vmem:[%s1142_s30 + $0x3e8] sm:$0xff] %vm588_vm0, %v585_v57  ;;  %v587_v63 = vadd.f32 %v459_v62, %v331_v60 }
  0xad   : > { %715 = vst.msk [vmem:[%s1142_s30 + $0x3f0] sm:$0xff] %vm588_vm0, %v586_v61 }
  0xae   : > { %716 = vst.msk [vmem:[%s1142_s30 + $0x3f8] sm:$0xff] %vm588_vm0, %v587_v63 }
  0xaf PF: > { %p15_p11 = scmp.ge.s32.totalorder %s1009_s14, 4   ;;  %s1678_s9 = smov %s958_s10 }
  0xb0   : > { %s1679_s10 = smov %s962_s11  ;;  %s1680_s11 = smov %s1019_s17 }
  0xb1   : > { %s1681_s12 = smov %s1009_s14  ;;  %17 = sbr.rel (!%p15_p11) target bundleno = 5 (0x5), region = 81 }
  0xb6   :  { %738 = vsyncpa [#allocation3], 1 }
  0xb7   :  { %740 = vsyncpa [#allocation3 + $0x1], 1 }
  0xb8   :  { %741 = vsyncpa [#allocation5], 1 }
  0xb9   :  { %743 = vsyncpa [#allocation5 + $0x1], 1 }

</bundles_post_ra>
